<compile_context>
chip_gen: v5e
topology: v5e:2x2
jax: 0.10.0
libtpu: 0.0.40
codegen_flags: <defaults>
</compile_context>

<pallas_src>
import functools

import jax
import jax.numpy as jnp
from jax.experimental import pallas as pl
from jax.experimental.pallas import tpu as pltpu


def _round_up(x, m):
    return (x + m - 1) // m * m


def _addbmm_kernel(*refs, alpha, beta, bb, has_bias, use_scratch):
    """Grid: (M tiles, N tiles, batch blocks).  Batch (axis 2) is the reduction."""
    i = 0
    if has_bias:
        bias_ref = refs[i]
        i += 1
    x1_ref, x2_ref, out_ref = refs[i], refs[i + 1], refs[i + 2]
    # For f32 outputs the resident output tile doubles as the accumulator.
    acc_ref = refs[i + 3] if use_scratch else out_ref

    kb = pl.program_id(2)

    @pl.when(kb == 0)
    def _():
        acc_ref[...] = jnp.zeros_like(acc_ref)

    # Hot loop: raw (unscaled) dot-accumulate over bb batches per grid step.
    acc = acc_ref[...]
    for b in range(bb):  # static unroll -> back-to-back MXU pushes
        acc = acc + jnp.dot(
            x1_ref[b], x2_ref[b], preferred_element_type=jnp.float32
        )
    acc_ref[...] = acc

    # Epilogue: apply alpha / beta*bias exactly once, after the reduction.
    @pl.when(kb == pl.num_programs(2) - 1)
    def _():
        res = acc_ref[...].astype(jnp.float32)
        if alpha != 1.0:  # compile-time specialization
            res = res * jnp.float32(alpha)
        if has_bias:  # beta == 0 drops the bias path entirely (torch semantics)
            # bias block is (tm, tn) or (1, tn); broadcast happens on the VPU.
            res = res + jnp.float32(beta) * bias_ref[...].astype(jnp.float32)
        out_ref[...] = res.astype(out_ref.dtype)


def addbmm(bias, x1, x2, *, alpha=1.0, beta=1.0):
    """Pallas implementation of torch.addbmm semantics."""
    x1 = jnp.asarray(x1)
    x2 = jnp.asarray(x2)
    bias = jnp.asarray(bias)

    B, M, K = x1.shape
    B2, K2, N = x2.shape
    assert B == B2 and K == K2, "x1/x2 batch or contraction dims mismatch"

    alpha = float(alpha)
    beta = float(beta)
    out_dtype = jnp.result_type(bias.dtype, x1.dtype, x2.dtype)
    # torch treats beta == 0 as "ignore bias" (even NaN/inf in bias).
    has_bias = beta != 0.0

    if B == 0:  # empty batch: grid would never run
        if not has_bias:
            return jnp.zeros((M, N), out_dtype)
        base = jnp.broadcast_to(bias, (M, N)).astype(jnp.float32)
        return (beta * base).astype(out_dtype)

    # ---- tile selection: lane-dense N (>=128), sublane-aligned M (mult of 8) ----
    if M <= 256:
        tm = _round_up(M, 8)
        M_pad = tm
    elif M % 256 == 0:
        tm, M_pad = 256, M
    elif M % 128 == 0:
        tm, M_pad = 128, M
    else:
        tm, M_pad = 128, _round_up(M, 128)

    if N <= 256:
        tn = _round_up(N, 128)
        N_pad = tn
    elif N % 256 == 0:
        tn, N_pad = 256, N
    elif N % 128 == 0:
        tn, N_pad = 128, N
    else:
        tn, N_pad = 128, _round_up(N, 128)

    # ---- batches per grid step, budgeted so double-buffered inputs fit v7x VMEM ----
    itemsize = max(jnp.dtype(x1.dtype).itemsize, jnp.dtype(x2.dtype).itemsize)
    budget = 12 * 1024 * 1024  # conservative per-buffer input budget (v7x: 32 MiB scoped)
    bb = 1
    for cand in (4, 2, 1):
        if B % cand == 0 and cand * (tm * K + K * tn) * itemsize <= budget:
            bb = cand
            break
    # K is kept untiled (full contraction per batch); fine for moderate K.

    # ---- pad operands so tiles divide evenly (zero padding is sum-neutral) ----
    if M_pad != M:
        x1 = jnp.pad(x1, ((0, 0), (0, M_pad - M), (0, 0)))
    if N_pad != N:
        x2 = jnp.pad(x2, ((0, 0), (0, 0), (0, N_pad - N)))

    # ---- bias: keep its own dtype; avoid materializing (M, N) for row biases ----
    in_specs = []
    args = []
    if has_bias:
        if bias.ndim <= 1 or (bias.ndim == 2 and bias.shape[0] == 1):
            row = jnp.broadcast_to(bias.reshape(1, -1), (1, N))
            if N_pad != N:
                row = jnp.pad(row, ((0, 0), (0, N_pad - N)))
            args.append(row)
            in_specs.append(pl.BlockSpec((1, tn), lambda i, j, k: (0, j)))
        else:
            full = jnp.broadcast_to(bias, (M, N))
            if M_pad != M or N_pad != N:
                full = jnp.pad(full, ((0, M_pad - M), (0, N_pad - N)))
            args.append(full)
            in_specs.append(pl.BlockSpec((tm, tn), lambda i, j, k: (i, j)))

    in_specs.append(pl.BlockSpec((bb, tm, K), lambda i, j, k: (k, i, 0)))  # x1 block
    in_specs.append(pl.BlockSpec((bb, K, tn), lambda i, j, k: (k, 0, j)))  # x2 block
    args += [x1, x2]

    use_scratch = out_dtype != jnp.float32
    scratch_shapes = [pltpu.VMEM((tm, tn), jnp.float32)] if use_scratch else []

    kernel = functools.partial(
        _addbmm_kernel,
        alpha=alpha,
        beta=beta,
        bb=bb,
        has_bias=has_bias,
        use_scratch=use_scratch,
    )

    out = pl.pallas_call(
        kernel,
        out_shape=jax.ShapeDtypeStruct((M_pad, N_pad), out_dtype),
        grid_spec=pltpu.PrefetchScalarGridSpec(
            num_scalar_prefetch=0,
            grid=(M_pad // tm, N_pad // tn, B // bb),
            in_specs=in_specs,
            out_specs=pl.BlockSpec((tm, tn), lambda i, j, k: (i, j)),
            scratch_shapes=scratch_shapes,
        ),
        compiler_params=pltpu.CompilerParams(
            dimension_semantics=("parallel", "parallel", "arbitrary"),
        ),
    )(*args)

    if M_pad != M or N_pad != N:
        out = out[:M, :N]
    return out


def addbmm_module_forward(bias, x1, x2, using_kwargs):
    """Mirrors AddBMMTorchFunctionModule.forward."""
    if using_kwargs:
        return addbmm(bias, x1, x2, alpha=2, beta=3)
    return addbmm(bias, x1, x2)


def _reference(bias, x1, x2, alpha, beta):
    out_dtype = jnp.result_type(bias.dtype, x1.dtype, x2.dtype)
    acc = jnp.einsum("bmk,bkn->mn", x1.astype(jnp.float32), x2.astype(jnp.float32))
    full_bias = jnp.broadcast_to(bias, acc.shape).astype(jnp.float32)
    return (beta * full_bias + alpha * acc).astype(out_dtype)


if __name__ == "__main__":
    key = jax.random.PRNGKey(0)
    k_bias, k_x1, k_x2, k_b2, k_xa, k_xb = jax.random.split(key, 6)

    # Small shapes consistent with the addbmm handler test module.
    B, M, K, N = 4, 8, 32, 16
    bias = jax.random.normal(k_bias, (M, N), dtype=jnp.float32)
    x1 = jax.random.normal(k_x1, (B, M, K), dtype=jnp.float32)
    x2 = jax.random.normal(k_x2, (B, K, N), dtype=jnp.float32)

    out_default = addbmm_module_forward(bias, x1, x2, using_kwargs=False)  # alpha=1, beta=1
    out_kwargs = addbmm_module_forward(bias, x1, x2, using_kwargs=True)    # alpha=2, beta=3
    jax.block_until_ready((out_default, out_kwargs))

    ref_default = _reference(bias, x1, x2, 1.0, 1.0)
    ref_kwargs = _reference(bias, x1, x2, 2.0, 3.0)
    assert out_default.shape == (M, N)
    assert jnp.allclose(out_default, ref_default, atol=1e-2, rtol=1e-2)
    assert jnp.allclose(out_kwargs, ref_kwargs, atol=1e-2, rtol=1e-2)

    # Exercise the tiled path (multiple N tiles, multi-batch blocks per step).
    B2, M2, K2, N2 = 4, 256, 128, 384
    bias2 = jax.random.normal(k_b2, (M2, N2), dtype=jnp.float32)
    xa = jax.random.normal(k_xa, (B2, M2, K2), dtype=jnp.float32)
    xb = jax.random.normal(k_xb, (B2, K2, N2), dtype=jnp.float32)
    out_tiled = addbmm(bias2, xa, xb, alpha=2, beta=3)
    jax.block_until_ready(out_tiled)
    ref_tiled = _reference(bias2, xa, xb, 2.0, 3.0)
    assert jnp.allclose(out_tiled, ref_tiled, atol=1e-2, rtol=1e-2)

    print("KERNEL_OK")
</pallas_src>

<mosaic_0001>
module attributes {stable_mosaic.version = 11 : i64} {
  func.func @_addbmm_kernel(%arg0: i32, %arg1: i32, %arg2: i32, %arg3: memref<8x128xf32, #tpu.memory_space<vmem>>, %arg4: memref<4x8x32xf32, #tpu.memory_space<vmem>>, %arg5: memref<4x32x128xf32, #tpu.memory_space<vmem>>, %arg6: memref<8x128xf32, #tpu.memory_space<vmem>>) attributes {dimension_semantics = [#tpu.dimension_semantics<parallel>, #tpu.dimension_semantics<parallel>, #tpu.dimension_semantics<arbitrary>], iteration_bounds = array<i64: 1, 1, 1>, scalar_prefetch = 0 : i64, scratch_operands = 0 : i64, tpu.core_type = #tpu.core_type<tc>, window_params = [{transform_indices = @transform_0, window_bounds = array<i64: 8, 128>}, {transform_indices = @transform_1, window_bounds = array<i64: 4, 8, 32>}, {transform_indices = @transform_2, window_bounds = array<i64: 4, 32, 128>}, {transform_indices = @transform_3, window_bounds = array<i64: 8, 128>}]} {
    %c0_i32 = arith.constant 0 : i32
    %0 = arith.cmpi eq, %arg2, %c0_i32 : i32
    %1 = arith.extui %0 : i1 to i32
    %c0_i32_0 = arith.constant 0 : i32
    %2 = arith.cmpi ne, %1, %c0_i32_0 : i32
    scf.if %2 {
      %cst_30 = arith.constant 0.000000e+00 : f32
      %32 = vector.broadcast %cst_30 : f32 to vector<8x128xf32>
      %c0_31 = arith.constant 0 : index
      %c0_32 = arith.constant 0 : index
      %33 = vector.load %arg6[%c0_31, %c0_32] : memref<8x128xf32, #tpu.memory_space<vmem>>, vector<8x128xf32>
      tpu.vector_store %arg6[%c0_31, %c0_32], %32 {strides = array<i32>} : memref<8x128xf32, #tpu.memory_space<vmem>>, vector<8x128xf32>,
    } else {
    }
    %c0 = arith.constant 0 : index
    %c0_1 = arith.constant 0 : index
    %3 = vector.load %arg6[%c0, %c0_1] : memref<8x128xf32, #tpu.memory_space<vmem>>, vector<8x128xf32>
    %c0_2 = arith.constant 0 : index
    %c0_3 = arith.constant 0 : index
    %c0_4 = arith.constant 0 : index
    %4 = vector.load %arg4[%c0_2, %c0_3, %c0_4] : memref<4x8x32xf32, #tpu.memory_space<vmem>>, vector<1x8x32xf32>
    %5 = vector.shape_cast %4 : vector<1x8x32xf32> to vector<8x32xf32>
    %c0_5 = arith.constant 0 : index
    %c0_6 = arith.constant 0 : index
    %c0_7 = arith.constant 0 : index
    %6 = vector.load %arg5[%c0_5, %c0_6, %c0_7] : memref<4x32x128xf32, #tpu.memory_space<vmem>>, vector<1x32x128xf32>
    %7 = vector.shape_cast %6 : vector<1x32x128xf32> to vector<32x128xf32>
    %cst = arith.constant dense<0.000000e+00> : vector<8x128xf32>
    %8 = tpu.matmul %5, %7, %cst {dimension_numbers = #tpu.dot_dimension_numbers<[1], [0], [0], [1], [0, 0, 1, 1], [], []>} : vector<8x32xf32>, vector<32x128xf32>, vector<8x128xf32> -> vector<8x128xf32>
    %9 = arith.addf %3, %8 : vector<8x128xf32>
    %c1 = arith.constant 1 : index
    %c0_8 = arith.constant 0 : index
    %c0_9 = arith.constant 0 : index
    %10 = vector.load %arg4[%c1, %c0_8, %c0_9] : memref<4x8x32xf32, #tpu.memory_space<vmem>>, vector<1x8x32xf32>
    %11 = vector.shape_cast %10 : vector<1x8x32xf32> to vector<8x32xf32>
    %c1_10 = arith.constant 1 : index
    %c0_11 = arith.constant 0 : index
    %c0_12 = arith.constant 0 : index
    %12 = vector.load %arg5[%c1_10, %c0_11, %c0_12] : memref<4x32x128xf32, #tpu.memory_space<vmem>>, vector<1x32x128xf32>
    %13 = vector.shape_cast %12 : vector<1x32x128xf32> to vector<32x128xf32>
    %cst_13 = arith.constant dense<0.000000e+00> : vector<8x128xf32>
    %14 = tpu.matmul %11, %13, %cst_13 {dimension_numbers = #tpu.dot_dimension_numbers<[1], [0], [0], [1], [0, 0, 1, 1], [], []>} : vector<8x32xf32>, vector<32x128xf32>, vector<8x128xf32> -> vector<8x128xf32>
    %15 = arith.addf %9, %14 : vector<8x128xf32>
    %c2 = arith.constant 2 : index
    %c0_14 = arith.constant 0 : index
    %c0_15 = arith.constant 0 : index
    %16 = vector.load %arg4[%c2, %c0_14, %c0_15] : memref<4x8x32xf32, #tpu.memory_space<vmem>>, vector<1x8x32xf32>
    %17 = vector.shape_cast %16 : vector<1x8x32xf32> to vector<8x32xf32>
    %c2_16 = arith.constant 2 : index
    %c0_17 = arith.constant 0 : index
    %c0_18 = arith.constant 0 : index
    %18 = vector.load %arg5[%c2_16, %c0_17, %c0_18] : memref<4x32x128xf32, #tpu.memory_space<vmem>>, vector<1x32x128xf32>
    %19 = vector.shape_cast %18 : vector<1x32x128xf32> to vector<32x128xf32>
    %cst_19 = arith.constant dense<0.000000e+00> : vector<8x128xf32>
    %20 = tpu.matmul %17, %19, %cst_19 {dimension_numbers = #tpu.dot_dimension_numbers<[1], [0], [0], [1], [0, 0, 1, 1], [], []>} : vector<8x32xf32>, vector<32x128xf32>, vector<8x128xf32> -> vector<8x128xf32>
    %21 = arith.addf %15, %20 : vector<8x128xf32>
    %c3 = arith.constant 3 : index
    %c0_20 = arith.constant 0 : index
    %c0_21 = arith.constant 0 : index
    %22 = vector.load %arg4[%c3, %c0_20, %c0_21] : memref<4x8x32xf32, #tpu.memory_space<vmem>>, vector<1x8x32xf32>
    %23 = vector.shape_cast %22 : vector<1x8x32xf32> to vector<8x32xf32>
    %c3_22 = arith.constant 3 : index
    %c0_23 = arith.constant 0 : index
    %c0_24 = arith.constant 0 : index
    %24 = vector.load %arg5[%c3_22, %c0_23, %c0_24] : memref<4x32x128xf32, #tpu.memory_space<vmem>>, vector<1x32x128xf32>
    %25 = vector.shape_cast %24 : vector<1x32x128xf32> to vector<32x128xf32>
    %cst_25 = arith.constant dense<0.000000e+00> : vector<8x128xf32>
    %26 = tpu.matmul %23, %25, %cst_25 {dimension_numbers = #tpu.dot_dimension_numbers<[1], [0], [0], [1], [0, 0, 1, 1], [], []>} : vector<8x32xf32>, vector<32x128xf32>, vector<8x128xf32> -> vector<8x128xf32>
    %27 = arith.addf %21, %26 : vector<8x128xf32>
    %c0_26 = arith.constant 0 : index
    %c0_27 = arith.constant 0 : index
    %28 = vector.load %arg6[%c0_26, %c0_27] : memref<8x128xf32, #tpu.memory_space<vmem>>, vector<8x128xf32>
    tpu.vector_store %arg6[%c0_26, %c0_27], %27 {strides = array<i32>} : memref<8x128xf32, #tpu.memory_space<vmem>>, vector<8x128xf32>,
    %c0_i32_28 = arith.constant 0 : i32
    %29 = arith.cmpi eq, %arg2, %c0_i32_28 : i32
    %30 = arith.extui %29 : i1 to i32
    %c0_i32_29 = arith.constant 0 : i32
    %31 = arith.cmpi ne, %30, %c0_i32_29 : i32
    scf.if %31 {
      %c0_30 = arith.constant 0 : index
      %c0_31 = arith.constant 0 : index
      %32 = vector.load %arg6[%c0_30, %c0_31] : memref<8x128xf32, #tpu.memory_space<vmem>>, vector<8x128xf32>
      %c0_32 = arith.constant 0 : index
      %c0_33 = arith.constant 0 : index
      %33 = vector.load %arg3[%c0_32, %c0_33] : memref<8x128xf32, #tpu.memory_space<vmem>>, vector<8x128xf32>
      %cst_34 = arith.constant 1.000000e+00 : f32
      %34 = vector.broadcast %cst_34 : f32 to vector<8x128xf32>
      %35 = arith.mulf %34, %33 : vector<8x128xf32>
      %36 = arith.addf %32, %35 : vector<8x128xf32>
      %c0_35 = arith.constant 0 : index
      %c0_36 = arith.constant 0 : index
      %37 = vector.load %arg6[%c0_35, %c0_36] : memref<8x128xf32, #tpu.memory_space<vmem>>, vector<8x128xf32>
      tpu.vector_store %arg6[%c0_35, %c0_36], %36 {strides = array<i32>} : memref<8x128xf32, #tpu.memory_space<vmem>>, vector<8x128xf32>,
    } else {
    }
    return
  }
  func.func @transform_0(%arg0: i32, %arg1: i32, %arg2: i32) -> (i32, i32) {
    %c0_i32 = arith.constant 0 : i32
    return %arg0, %arg1 : i32, i32
  }
  func.func @transform_1(%arg0: i32, %arg1: i32, %arg2: i32) -> (i32, i32, i32) {
    %c0_i32 = arith.constant 0 : i32
    %c0_i32_0 = arith.constant 0 : i32
    return %arg2, %arg0, %c0_i32 : i32, i32, i32
  }
  func.func @transform_2(%arg0: i32, %arg1: i32, %arg2: i32) -> (i32, i32, i32) {
    %c0_i32 = arith.constant 0 : i32
    %c0_i32_0 = arith.constant 0 : i32
    return %arg2, %c0_i32, %arg1 : i32, i32, i32
  }
  func.func @transform_3(%arg0: i32, %arg1: i32, %arg2: i32) -> (i32, i32) {
    %c0_i32 = arith.constant 0 : i32
    return %arg0, %arg1 : i32, i32
  }
}

</mosaic_0001>

<bundles_post_ra>
// kernel: tpu_custom_call.1
= control target key start
LH: loop header
LB: loop body
LE: loop exit
PB: predicated region body
PF: predicated region fallthrough
CT: control target
= control target key end

     0   :  { %8 = vsyncpa [#allocation3], 0  ;;  %s370_s0 = inlined_call_operand.hbm [shape: f32[8,128], index: 0, kind: input, shape index: {}]   ;;  %s371_s1 = inlined_call_operand.hbm [shape: f32[4,8,32], index: 1, kind: input, shape index: {}]   ;;  %s372_s2 = inlined_call_operand.hbm [shape: f32[4,32,128], index: 2, kind: input, shape index: {}]   ;;  %s373_s3 = inlined_call_operand.hbm [shape: f32[8,128], index: 3, kind: output, shape index: {}]  }
   0x1   :  { %9 = vsyncpa [#allocation6], 0  ;;  %s26_s14 = sshll.u32 %s371_s1, 4  ;;  %s27_s14 = int_to_ptr.hbm [resolvable:$true] %s26_s14 }
   0x2   :  { %10 = vsyncpa [#allocation4], 0  ;;  %s328_s15 = smov [#allocation5]   ;;  %s16_s19 = sshll.u32 %s370_s0, 4  ;;  %s17_s19 = int_to_ptr.hbm [resolvable:$true] %s16_s19 }
   0x3   :  { %s28_s16 = sshll.u32 %s328_s15, 4  ;;  %s329_s20 = smov 128   ;;  %s29_s16 = int_to_ptr.vmem [resolvable:$true] %s28_s16 }
   0x4   :  { %s330_s21 = smov 8   ;;  %s331_s22 = smov [#allocation2]  }
   0x5   :  { %34 = dma.hbm_to_vmem [thread:$0]  %s27_s14, 512, %s29_s16, [#allocation6], %s329_s20, %s329_s20, %s330_s21  }
   0x6   :  { %s18_s23 = sshll.u32 %s331_s22, 4  ;;  %s39_s26 = sshll.u32 %s372_s2, 4  ;;  %s19_s23 = int_to_ptr.vmem [resolvable:$true] %s18_s23  ;;  %s40_s26 = int_to_ptr.hbm [resolvable:$true] %s39_s26 }
   0x7   :  { %21 = dma.hbm_to_vmem [thread:$0]  %s17_s19, 128, %s19_s23, [#allocation3]  }
   0x8   :  { %s332_s1 = smov [#allocation7]  }
   0x9   :  { %s41_s27 = sshll.u32 %s332_s1, 4  ;;  %s42_s27 = int_to_ptr.vmem [resolvable:$true] %s41_s27 }
   0xa   :  { %47 = dma.hbm_to_vmem [thread:$0]  %s40_s26, 2048, %s42_s27, [#allocation6], %s329_s20, %s329_s20, %s330_s21  }
   0xb   :  { %322 = dma.done.wait [#allocation3], 128  }
   0xc   :  { %323 = vsyncadd [#allocation3], 4294967168 }
   0xd   :  { %324 = dma.done.wait [#allocation6], 2560  }
   0xe   :  { %325 = vsyncadd [#allocation6], 4294964736  ;;  %v133_v0 = vld [vmem:[#allocation7 + $0x58] sm:$0xff]  ;;  %v132_v2 = vld [vmem:[#allocation7 + $0x50] sm:$0xff]  ;;  %vm71_vm0 = vcmask 261120   ;;  %s333_s0 = smov [#allocation8]  }
   0xf   :  { %v70_v1 = vld [vmem:[#allocation7 + $0x18] sm:$0xff]  ;;  %149 = vmatpush.msra.mxu2 %v133_v0  ;;  %v69_v4 = vld [vmem:[#allocation7 + $0x10] sm:$0xff]  ;;  %v131_v6 = vld [vmem:[#allocation7 + $0x48] sm:$0xff]  ;;  %s202_s2 = sshll.u32 %s333_s0, 4  ;;  %s204_s30 = sshll.u32 %s373_s3, 4  ;;  %s203_s2 = int_to_ptr.vmem [resolvable:$true] %s202_s2  ;;  %s205_s30 = int_to_ptr.hbm [resolvable:$true] %s204_s30 }
  0x10   :  { %87 = vmatpush.msra.mxu0 %v70_v1  ;;  %v164_v3 = vld [vmem:[#allocation7 + $0x78] sm:$0xff]  ;;  %v163_v7 = vld [vmem:[#allocation7 + $0x70] sm:$0xff]  ;;  %v68_v8 = vld [vmem:[#allocation7 + $0x8] sm:$0xff] }
  0x11   :  { %v102_v5 = vld [vmem:[#allocation7 + $0x38] sm:$0xff]  ;;  %180 = vmatpush.msra.mxu3 %v164_v3  ;;  %150 = vmatpush.msra.mxu2 %v132_v2  ;;  %v101_v9 = vld [vmem:[#allocation7 + $0x30] sm:$0xff]  ;;  %v162_v10 = vld [vmem:[#allocation7 + $0x68] sm:$0xff] }
  0x12   :  { %118 = vmatpush.msra.mxu1 %v102_v5  ;;  %88 = vmatpush.msra.mxu0 %v69_v4  ;;  %v130_v11 = vld [vmem:[#allocation7 + $0x40] sm:$0xff]  ;;  %v100_v13 = vld [vmem:[#allocation7 + $0x28] sm:$0xff]  ;;  %v128_v14 = vld [vmem:[#allocation5 + $0x10] sm:$0xff] }
  0x13   :  { %181 = vmatpush.msra.mxu3 %v163_v7  ;;  %v67_v12 = vld [vmem:[#allocation7] sm:$0xff]  ;;  %151 = vmatpush.msra.mxu2 %v131_v6  ;;  %v159_v17 = vld [vmem:[#allocation5 + $0x18] sm:$0xff]  ;;  %v97_v19 = vld [vmem:[#allocation5 + $0x8] sm:$0xff] }
  0x14   :  { %119 = vmatpush.msra.mxu1 %v101_v9  ;;  %89 = vmatpush.msra.mxu0 %v68_v8  ;;  %v161_v15 = vld [vmem:[#allocation7 + $0x60] sm:$0xff]  ;;  %v194_v26 = vld [vmem:[#allocation2] sm:$0xff] }
  0x15   :  { %182 = vmatpush.msra.mxu3 %v162_v10  ;;  %v66_v16 = vld [vmem:[#allocation5] sm:$0xff]  ;;  %152 = vmatpush.msra.mxu2 %v130_v11 }
  0x16   :  { %120 = vmatpush.msra.mxu1 %v100_v13  ;;  %90 = vmatpush.msra.mxu0 %v67_v12  ;;  %v99_v18 = vld [vmem:[#allocation7 + $0x20] sm:$0xff] }
  0x17   :  { %217 = vmatmul.msk.f32.vlgmr.msra.gmra.mxu2 %vm71_vm0, %v128_v14  ;;  %183 = vmatpush.msra.mxu3 %v161_v15 }
  0x18   :  { %215 = vmatmul.msk.f32.vlgmr.msra.gmra.mxu0 %vm71_vm0, %v66_v16  ;;  %218 = vmatmul.msk.f32.vlgmr.msra.gmra.mxu3 %vm71_vm0, %v159_v17 }
  0x19   :  { %121 = vmatpush.msra.mxu1 %v99_v18 }
  0x1a   :  { %216 = vmatmul.msk.f32.vlgmr.msra.gmra.mxu1 %vm71_vm0, %v97_v19 }
  0x95   :  { %v92_v20 = vpop.f32.mrf.mxu0 }
  0x97   :  { %v123_v21 = vpop.f32.mrf.mxu1 }
  0x98   :  { %v126_v22 = vadd.f32 %v123_v21, %v92_v20 }
  0x9a   :  { %v154_v23 = vpop.f32.mrf.mxu2 }
  0x9b   :  { %v157_v24 = vadd.f32 %v154_v23, %v126_v22  ;;  %v185_v25 = vpop.f32.mrf.mxu3 }
  0x9d   :  { %v188_v27 = vadd.f32 %v185_v25, %v157_v24 }
  0x9f   :  { %v195_v28 = vadd.f32 %v194_v26, %v188_v27 }
  0xa1   :  { %196 = vst [vmem:[#allocation8] sm:$0xff] %v195_v28 }
  0xa2   :  { %207 = dma.vmem_to_hbm [thread:$0]  %s203_s2, 128, %s205_s30, [#allocation4]  }
  0xa3   :  { %326 = dma.done.wait [#allocation4], 128  }
  0xa4   :  { %327 = vsyncadd [#allocation4], 4294967168 }
  0xa5   :  { %212 = vsyncpa [#allocation3], 1 }
  0xa6   :  { %213 = vsyncpa [#allocation6], 1 }
  0xa7   :  { %214 = vsyncpa [#allocation4], 1 }

</bundles_post_ra>
